<compile_context>
chip_gen: v6e
topology: v6e:2x2x1
jax: 0.10.0
libtpu: 0.0.40
codegen_flags: <defaults>
</compile_context>

<pallas_src>
import functools

import jax
import jax.numpy as jnp
from jax.experimental import pallas as pl
from jax.experimental.pallas import tpu as pltpu

_LANE = 128
_SUB = 8


def _round_up(a, b):
    return (a + b - 1) // b * b


def _group_sum_kernel(gid_ref, x_ref, out_ref, *, n_valid):
    # gid_ref: [1, n_tile]   int32 group id per row of this tile (-1 = padding)
    # x_ref:   [n_tile, chunk] x-dtype rows (chunk lanes of flattened M*H*W)
    # out_ref: [G, chunk]    float32 accumulator, resident across the row axis
    r = pl.program_id(1)

    @pl.when(r == 0)
    def _init():
        out_ref[...] = jnp.zeros_like(out_ref)

    n_tile = x_ref.shape[0]
    num_groups = out_ref.shape[0]

    x = x_ref[...]
    if n_valid % n_tile != 0:
        # The last row tile overruns the array; zero out-of-range rows.
        # (jnp.where, not multiply: 0 * garbage could be NaN.)
        row = r * n_tile + jax.lax.broadcasted_iota(jnp.int32, (n_tile, 1), 0)
        x = jnp.where(row < n_valid, x, 0)

    gids = gid_ref[...]                                               # [1, n_tile]
    giota = jax.lax.broadcasted_iota(jnp.int32, (num_groups, n_tile), 0)
    onehot = (giota == gids).astype(x.dtype)                          # [G, n_tile]

    out_ref[...] += jnp.dot(onehot, x, preferred_element_type=jnp.float32)


def _vmem_limit_bytes():
    cap = None
    try:
        cap = getattr(pltpu.get_tpu_info(), "vmem_capacity_bytes", None)
    except Exception:
        cap = None
    if not cap:
        cap = 64 * 1024 * 1024          # conservative (v7x-sized) fallback
    return min(int(cap) * 3 // 4, 100 * 1024 * 1024)


def _choose_tiling(n, mhw, num_groups, itemsize, vmem_budget):
    mhw_pad = _round_up(mhw, _LANE)
    g_pad = _round_up(max(num_groups, 1), _SUB)
    n_cap = max(_SUB, _round_up(n, _SUB))

    def vmem_use(rows, chunk):
        x_tile = rows * chunk * itemsize                  # one x buffer
        gid = _SUB * _round_up(rows, _LANE) * 4           # one gid buffer (padded)
        acc = g_pad * chunk * 4                           # one accumulator buffer
        return 2 * (x_tile + gid + acc)                   # Pallas double-buffers

    # Lane chunk: start at half of M*H*W (>=2 chunks -> both v7x TCs via the
    # "parallel" axis), then halve until a minimal 8-row tile fits in VMEM.
    chunk = mhw_pad if mhw_pad < 2 * _LANE else _round_up(pl.cdiv(mhw_pad, 2), _LANE)
    while chunk > _LANE and vmem_use(_SUB, chunk) > vmem_budget:
        chunk = _round_up(pl.cdiv(chunk, 2), _LANE)

    # Row tile: target ~16 MiB x tiles (amortizes ~0.35us per-step overhead).
    target_tile_bytes = 16 * 1024 * 1024
    rows = min(n_cap, max(_SUB, target_tile_bytes // max(1, chunk * itemsize)))
    rows = max(_SUB, rows // _SUB * _SUB)
    while rows > _SUB and vmem_use(rows, chunk) > vmem_budget:
        rows -= _SUB
    return rows, chunk


def avg_pool_vectors_per_wsi(x, assignment, numgroups, *,
                             rows_per_tile=None, lane_chunk=None):
    """
    x:          [N, M, H, W] array (any float dtype; bf16 halves HBM traffic).
    assignment: [N] int array of group ids (min 0).
    numgroups:  static python int == int(max(assignment)) + 1.
    returns:    [numgroups, M, 1, 1] float32.
    """
    N, M, H, W = x.shape
    HW = H * W
    MHW = M * HW

    # Free reshape of contiguous NCHW -- no transpose / pad copy of x in HBM.
    x2 = x.reshape(N, MHW)
    itemsize = x2.dtype.itemsize

    vmem_limit = _vmem_limit_bytes()
    rows, chunk = _choose_tiling(N, MHW, numgroups, itemsize,
                                 int(vmem_limit * 0.8))
    if rows_per_tile is not None:
        rows = max(_SUB, int(rows_per_tile) // _SUB * _SUB)
    if lane_chunk is not None:
        chunk = max(_LANE, _round_up(int(lane_chunk), _LANE))

    num_row_tiles = pl.cdiv(N, rows)
    num_chunks = pl.cdiv(MHW, chunk)
    rows_total = num_row_tiles * rows

    # Per-row group ids, padded with -1 (no group) for rows >= N; shaped
    # [num_row_tiles, rows] so each grid step sees a [1, rows] lane vector.
    gid = jnp.full((rows_total,), -1, dtype=jnp.int32)
    gid = gid.at[:N].set(assignment.astype(jnp.int32))
    gid = gid.reshape(num_row_tiles, rows)

    kernel = functools.partial(_group_sum_kernel, n_valid=N)

    sums = pl.pallas_call(
        kernel,
        out_shape=jax.ShapeDtypeStruct((numgroups, MHW), jnp.float32),
        grid_spec=pltpu.PrefetchScalarGridSpec(
            num_scalar_prefetch=0,
            grid=(num_chunks, num_row_tiles),
            in_specs=[
                pl.BlockSpec((1, rows), lambda c, r: (r, 0)),         # gid
                pl.BlockSpec((rows, chunk), lambda c, r: (r, c)),     # x rows
            ],
            out_specs=pl.BlockSpec((numgroups, chunk), lambda c, r: (0, c)),
        ),
        compiler_params=pltpu.CompilerParams(
            dimension_semantics=("parallel", "arbitrary"),
            vmem_limit_bytes=vmem_limit,
        ),
    )(gid, x2)                                                         # [G, MHW] f32

    # Cheap wrapper finalize on G*M*HW elements: spatial mean + per-group scale.
    counts = jnp.zeros((numgroups,), jnp.float32).at[assignment].add(1.0)
    per_group = sums.reshape(numgroups, M, HW).sum(axis=-1)            # [G, M]
    # Note: empty groups give 0/0 = NaN, matching the torch module's behavior.
    out = per_group / (counts[:, None] * float(HW))
    return out.reshape(numgroups, M, 1, 1)


def _reference(x, assignment, numgroups):
    """Pure-JAX reference matching the torch module."""
    N, M, H, W = x.shape
    onehot = (assignment[None, :] == jnp.arange(numgroups)[:, None]).astype(jnp.float32)
    s = jnp.sum(x.astype(jnp.float32), axis=(2, 3))          # [N, M]
    sums = onehot @ s                                        # [G, M]
    counts = jnp.sum(onehot, axis=1, keepdims=True)          # [G, 1]
    return (sums / (counts * H * W)).reshape(numgroups, M, 1, 1)


if __name__ == "__main__":
    key = jax.random.PRNGKey(0)
    k1, k2, k3 = jax.random.split(key, 3)

    # Test 1: small case, default (heuristic) tiling; 2 lane chunks.
    N, M, H, W = 8, 32, 4, 4
    x = jax.random.normal(k1, (N, M, H, W), dtype=jnp.float32)
    assignment = jnp.array([0, 1, 2, 0, 1, 2, 0, 1], dtype=jnp.int32)
    numgroups = int(jnp.max(assignment)) + 1           # static, like torch code
    out = jax.block_until_ready(avg_pool_vectors_per_wsi(x, assignment, numgroups))
    ref = _reference(x, assignment, numgroups)
    assert out.shape == (numgroups, M, 1, 1)
    assert jnp.allclose(out, ref, atol=1e-5, rtol=1e-5)

    # Test 2: numgroups == 1 special case (divide by N*H*W).
    assignment1 = jnp.zeros((N,), dtype=jnp.int32)
    out1 = jax.block_until_ready(avg_pool_vectors_per_wsi(x, assignment1, 1))
    ref1 = _reference(x, assignment1, 1)
    assert out1.shape == (1, M, 1, 1)
    assert jnp.allclose(out1, ref1, atol=1e-5, rtol=1e-5)

    # Test 3: forced multi-tile grid with out-of-bounds row AND lane tails.
    N2, M2, H2, W2 = 20, 6, 6, 6          # MHW = 216; 2 chunks of 128, 3 row tiles of 8
    x2 = jax.random.normal(k2, (N2, M2, H2, W2), dtype=jnp.float32)
    assignment2 = (jnp.arange(N2) % 4).astype(jnp.int32)
    numgroups2 = int(jnp.max(assignment2)) + 1
    out2 = jax.block_until_ready(
        avg_pool_vectors_per_wsi(x2, assignment2, numgroups2,
                                 rows_per_tile=8, lane_chunk=128))
    ref2 = _reference(x2, assignment2, numgroups2)
    assert out2.shape == (numgroups2, M2, 1, 1)
    assert jnp.allclose(out2, ref2, atol=1e-4, rtol=1e-4)

    # Test 4: bf16 input (halves HBM traffic; f32 accumulation in the kernel).
    xb = x.astype(jnp.bfloat16)
    outb = jax.block_until_ready(avg_pool_vectors_per_wsi(xb, assignment, numgroups))
    assert jnp.allclose(outb, ref, atol=5e-2, rtol=5e-2)

    # Test 5: default heuristic with a partially out-of-bounds lane chunk.
    N3, M3, H3, W3 = 200, 10, 3, 5        # MHW = 150 -> chunks of 128 (2nd overruns)
    x3 = jax.random.normal(k3, (N3, M3, H3, W3), dtype=jnp.float32)
    assignment3 = (jnp.arange(N3) % 7).astype(jnp.int32)
    numgroups3 = int(jnp.max(assignment3)) + 1
    out3 = jax.block_until_ready(avg_pool_vectors_per_wsi(x3, assignment3, numgroups3))
    ref3 = _reference(x3, assignment3, numgroups3)
    assert out3.shape == (numgroups3, M3, 1, 1)
    assert jnp.allclose(out3, ref3, atol=1e-4, rtol=1e-4)

    print("KERNEL_OK")
</pallas_src>

<mosaic_0001>
module attributes {stable_mosaic.version = 11 : i64} {
  func.func @_group_sum_kernel(%arg0: i32, %arg1: i32, %arg2: memref<1x8xi32, #tpu.memory_space<vmem>>, %arg3: memref<8x256xf32, #tpu.memory_space<vmem>>, %arg4: memref<3x256xf32, #tpu.memory_space<vmem>>) attributes {dimension_semantics = [#tpu.dimension_semantics<parallel>, #tpu.dimension_semantics<arbitrary>], iteration_bounds = array<i64: 2, 1>, scalar_prefetch = 0 : i64, scratch_operands = 0 : i64, tpu.core_type = #tpu.core_type<tc>, window_params = [{transform_indices = @transform_0, window_bounds = array<i64: 1, 8>}, {transform_indices = @transform_1, window_bounds = array<i64: 8, 256>}, {transform_indices = @transform_2, window_bounds = array<i64: 3, 256>}]} {
    %c0_i32 = arith.constant 0 : i32
    %0 = arith.cmpi eq, %arg1, %c0_i32 : i32
    %1 = arith.extui %0 : i1 to i32
    %c0_i32_0 = arith.constant 0 : i32
    %2 = arith.cmpi ne, %1, %c0_i32_0 : i32
    scf.if %2 {
      %cst_8 = arith.constant 0.000000e+00 : f32
      %14 = vector.broadcast %cst_8 : f32 to vector<3x256xf32>
      %c0_9 = arith.constant 0 : index
      %c0_10 = arith.constant 0 : index
      %15 = vector.load %arg4[%c0_9, %c0_10] : memref<3x256xf32, #tpu.memory_space<vmem>>, vector<3x256xf32>
      tpu.vector_store %arg4[%c0_9, %c0_10], %14 {strides = array<i32>} : memref<3x256xf32, #tpu.memory_space<vmem>>, vector<3x256xf32>,
    } else {
    }
    %c0 = arith.constant 0 : index
    %c0_1 = arith.constant 0 : index
    %3 = vector.load %arg3[%c0, %c0_1] : memref<8x256xf32, #tpu.memory_space<vmem>>, vector<8x256xf32>
    %c0_2 = arith.constant 0 : index
    %c0_3 = arith.constant 0 : index
    %4 = vector.load %arg2[%c0_2, %c0_3] : memref<1x8xi32, #tpu.memory_space<vmem>>, vector<1x8xi32>
    %5 = tpu.iota {dimensions = array<i32: 0>} : vector<3x8xi32>
    %6 = vector.broadcast %4 : vector<1x8xi32> to vector<3x8xi32>
    %7 = arith.cmpi eq, %5, %6 : vector<3x8xi32>
    %8 = arith.extui %7 : vector<3x8xi1> to vector<3x8xi32>
    %9 = arith.sitofp %8 : vector<3x8xi32> to vector<3x8xf32>
    %c0_4 = arith.constant 0 : index
    %c0_5 = arith.constant 0 : index
    %10 = vector.load %arg4[%c0_4, %c0_5] : memref<3x256xf32, #tpu.memory_space<vmem>>, vector<3x256xf32>
    %cst = arith.constant dense<0.000000e+00> : vector<3x256xf32>
    %11 = tpu.matmul %9, %3, %cst {dimension_numbers = #tpu.dot_dimension_numbers<[1], [0], [0], [1], [0, 0, 1, 1], [], []>} : vector<3x8xf32>, vector<8x256xf32>, vector<3x256xf32> -> vector<3x256xf32>
    %12 = arith.addf %10, %11 : vector<3x256xf32>
    %c0_6 = arith.constant 0 : index
    %c0_7 = arith.constant 0 : index
    %13 = vector.load %arg4[%c0_6, %c0_7] : memref<3x256xf32, #tpu.memory_space<vmem>>, vector<3x256xf32>
    tpu.vector_store %arg4[%c0_6, %c0_7], %12 {strides = array<i32>} : memref<3x256xf32, #tpu.memory_space<vmem>>, vector<3x256xf32>,
    return
  }
  func.func @transform_0(%arg0: i32, %arg1: i32) -> (i32, i32) {
    %c0_i32 = arith.constant 0 : i32
    %c0_i32_0 = arith.constant 0 : i32
    return %arg1, %c0_i32 : i32, i32
  }
  func.func @transform_1(%arg0: i32, %arg1: i32) -> (i32, i32) {
    %c0_i32 = arith.constant 0 : i32
    return %arg1, %arg0 : i32, i32
  }
  func.func @transform_2(%arg0: i32, %arg1: i32) -> (i32, i32) {
    %c0_i32 = arith.constant 0 : i32
    %c0_i32_0 = arith.constant 0 : i32
    return %c0_i32, %arg0 : i32, i32
  }
}

</mosaic_0001>

<bundles_post_ra>
// kernel: tpu_custom_call.1
= control target key start
LH: loop header
LB: loop body
LE: loop exit
PB: predicated region body
PF: predicated region fallthrough
CT: control target
= control target key end

     0   :  { %7 = vsyncpa [#allocation3], 0  ;;  %s824_s0 = inlined_call_operand.hbm [shape: s32[1,8], index: 0, kind: input, shape index: {}]   ;;  %s825_s1 = inlined_call_operand.hbm [shape: f32[8,512], index: 1, kind: input, shape index: {}]   ;;  %s826_s2 = inlined_call_operand.hbm [shape: f32[3,512], index: 2, kind: output, shape index: {}]  }
   0x1   :  { %8 = vsyncpa [#allocation6], 0 }
   0x2   :  { %10 = vsyncpa [#allocation6 + $0x1], 0 }
   0x3   :  { %11 = vsyncpa [#allocation4], 0 }
   0x4   :  { %13 = vsyncpa [#allocation4 + $0x1], 0  ;;  %s662_s9 = smov 0   ;;  %s664_s10 = smov 0  }
   0x5   :  { %s666_s11 = smov 0   ;;  %s668_s12 = smov 0  }
   0x6   :  { %s670_s13 = smov 0   ;;  %s672_s14 = smov 0  }
   0x7 LB: > { %s407_s15 = sadd.s32 4294967295, %s641_s14   ;;  %s408_s16 = sadd.s32 4294967294, %s641_s14   ;;  %s641_s14 = sphi %s672_s14, %s19_s14   ;;  %s637_s13 = sphi %s670_s13, %s843_s13   ;;  %s633_s12 = sphi %s668_s12, %s842_s12   ;;  %s629_s11 = sphi %s666_s11, %s841_s11   ;;  %s625_s10 = sphi %s664_s10, %s840_s10   ;;  %s621_s9 = sphi %s662_s9, %s839_s9  }
   0x8   : > { %p79_p0 = scmp.ne.s32.totalorder %s625_s10, %s621_s9  ;;  %p696_p1 = scmp.eq.s32.totalorder %s407_s15, 0 }
   0x9   : > { %p700_p2 = scmp.eq.s32.totalorder %s407_s15, 1  ;;  %p109_p3 = scmp.eq.s32.totalorder %s408_s16, 1 }
   0xa   : > { %p706_p4 = por %p696_p1, %p79_p0  ;;  %p409_p5 = scmp.ge.s32.totalorder %s641_s14, 1 }
   0xb   : > { %p711_p6 = por %p109_p3, %p79_p0  ;;  %p116_p7 = scmp.lt.s32.totalorder %s641_s14, 3 }
   0xc   : > { %s830_s19 = scalar_select %p706_p4, 1, 0 }
   0xd   : > { %s831_s20 = scalar_select %p711_p6, 1, 0 }
   0xe   : > { %p716_p8 = pnand %p409_p5, %p116_p7  ;;  %s643_s22 = smov [#allocation2]  }
   0xf   : > { %s131_s23 = sshll.u32 %s643_s22, 4  ;;  %s31_s25 = sadd.s32 1, %s637_s13  ;;  %s132_s23 = int_to_ptr.vmem [resolvable:$true] %s131_s23 }
  0x10   : > { %p437_p10 = pneg %p716_p8  ;;  %s66_s26 = sadd.s32 1, %s629_s11 }
  0x11   : > { %p33_p12 = scmp.ge.s32.totalorder %s31_s25, 2  ;;  %s514_s27 = scalar_lea.vmem %s132_s23, 16 }
  0x12   : > { %p725_p11 = pnand %p437_p10, %p696_p1  ;;  %p515_p0 = scmp.ne.s32.totalorder %s132_s23, %s514_s27 }
  0x13   : > { %s521_s28 = scalar_lea.vmem %s132_s23, 32  ;;  %p522_p7 = scmp.lt.s32.totalorder %s132_s23, %s132_s23 }
  0x14   : > { %p505_p13 = pneg %p725_p11  ;;  %p523_p9 = scmp.lt.s32.totalorder %s521_s28, %s514_s27 }
  0x16   : > { %p517_p3 = pnand %p515_p0, %p505_p13  ;;  %p524_p6 = por %p523_p9, %p522_p7 }
  0x18   : > { %p518_p5 = pneg %p517_p3 }
  0x1a   : > { %p525_p4 = pnand %p524_p6, %p518_p5 }
  0x1c   : > { %528 = shalt.err (!%p525_p4)
}
  0x1d   : > { %440 = dma.hbm_to_vmem [thread:$0]  (!%p725_p11), %s824_s0, 16, %s132_s23, [#allocation3]  }
  0x1e   : > { %s845_s25 = smov (%p33_p12, %s31_s25), 0  ;;  %p73_p6 = scmp.ne.s32.totalorder %s629_s11, %s625_s10 }
  0x1f   : > { %p74_p4 = scmp.eq.s32.totalorder %s641_s14, 0  ;;  %s62_s3 = ssub.s32 %s637_s13, %s845_s25 }
  0x20   : > { %p450_p9 = scmp.lt.s32.totalorder %s641_s14, 2  ;;  %p64_p10 = scmp.eq.s32.totalorder %s62_s3, 0 }
  0x21   : > { %p75_p13 = por %p74_p4, %p73_p6  ;;  %p748_p0 = por %p700_p2, %p73_p6 }
  0x22   : > { %s142_s5 = sand.u32 1, %s629_s11   ;;  %s427_s8 = sshll.u32 %s637_s13, 8 }
  0x23   : > { %s754_s6 = scalar_select %p64_p10, %s629_s11, %s66_s26  }
  0x24   : > { %s412_s7 = sshll.u32 %s142_s5, 4  ;;  %s154_s22 = scalar_lea.hbm %s825_s1, %s427_s8 }
  0x25   : > { %s146_s23 = scalar_lea.vmem [#allocation5], %s412_s7  ;;  %p760_p11 = pnand %p450_p9, %p75_p13 }
  0x26   : > { %s156_s24 = sshll.u32 %s146_s23, 4  ;;  %s143_s18 = scalar_lea.sflag [#allocation6], %s142_s5  ;;  %s157_s24 = int_to_ptr.vmem [resolvable:$true] %s156_s24 }
  0x27   : > { %p531_p2 = pneg %p760_p11  ;;  %s542_s28 = scalar_lea.vmem %s157_s24, 256 }
  0x28   : > { %p543_p12 = scmp.ne.s32.totalorder %s157_s24, %s542_s28  ;;  %s644_s26 = smov [#allocation5]  }
  0x29   : > { %s547_s29 = sshll.u32 %s644_s26, 4  ;;  %s548_s29 = int_to_ptr.vmem [resolvable:$false] %s547_s29 }
  0x2a   : > { %p545_p3 = pnand %p543_p12, %p531_p2  ;;  %s549_s30 = scalar_lea.vmem %s548_s29, 512 }
  0x2b   : > { %p550_p7 = scmp.lt.s32.totalorder %s157_s24, %s548_s29  ;;  %p551_p6 = scmp.lt.s32.totalorder %s549_s30, %s542_s28 }
  0x2c   : > { %p546_p5 = pneg %p545_p3 }
  0x2d   : > { %p552_p4 = por %p551_p6, %p550_p7 }
  0x2f   : > { %p553_p10 = pnand %p552_p4, %p546_p5 }
  0x31   : > { %556 = shalt.err (!%p553_p10)
}
  0x32   : > { %444 = dma.hbm_to_vmem [thread:$0]  (!%p760_p11), %s154_s22, 256, %s157_s24, %s143_s18  }
  0x33   : > { %165 = sbr.rel (%p716_p8) target bundleno = 279 (0x117), region = 28 }
  0x38   : > { %608 = dma.done.wait (%p696_p1), [#allocation3], 16  }
  0x39   : > { %610 = vsyncadd (%p696_p1), [#allocation3], 4294967280  ;;  %s775_s3 = sand.u32 1, %s625_s10   ;;  %p836_p9 = scmp.ne.s32.totalorder %s830_s19, 0 }
  0x3a   : > { %s417_s5 = sshll.u32 %s775_s3, 4  ;;  %s172_s7 = scalar_lea.sflag [#allocation6], %s775_s3 }
  0x3b   : > { %s175_s8 = scalar_lea.vmem [#allocation5], %s417_s5 }
  0x3c   : > { %612 = dma.done.wait (%p836_p9), %s172_s7, 256  }
  0x3d   : > { %614 = vsyncadd (%p836_p9), %s172_s7, 4294967040  ;;  %s418_s21 = sshll.u32 %s775_s3, 3  ;;  %v206_v0 = vlaneseq  ;;  %v645_v1 = vmov 0.0   ;;  %v204_v3 = vld [vmem:[%s175_s8 + $0x8] sm:$0xff]  ;;  %v203_v4 = vld [vmem:[%s175_s8] sm:$0xff]  ;;  %vm216_vm0 = vcmask 64512  }
  0x3e   : > { %284 = vmatprep.mubr.f32.mxu0 %v645_v1  ;;  %s195_s17 = scalar_lea.vmem [#allocation7], %s418_s21  ;;  %v419_v5 = vld [vmem:[#allocation2] ss:$0 sm:$0xff]  ;;  %250 = vmatprep.subr.mxu0 %v204_v3  ;;  %s428_s19 = sshll.u32 %s633_s12, 7 }
  0x3f   : > { %202 = vst [vmem:[%s195_s17] sm:$0x77] %v645_v1  ;;  %v207_v2 = vshrl.u32 %v206_v0, 7  ;;  %251 = vmatpush1.msra.mxu0 %v203_v4  ;;  %s312_s15 = sshll.u32 %s195_s17, 4  ;;  %s310_s23 = scalar_lea.hbm %s826_s2, %s428_s19  ;;  %s313_s15 = int_to_ptr.vmem [resolvable:$true] %s312_s15 }
  0x40   : > { %s298_s24 = scalar_lea.sflag [#allocation4], %s775_s3  ;;  %s557_s27 = scalar_lea.vmem %s313_s15, 128 }
  0x41   : > { %vm212_vm1 = vcmp.eq.s32.totalorder %v207_v2, %v419_v5  ;;  %p558_p1 = scmp.ne.s32.totalorder %s313_s15, %s557_s27  ;;  %s646_s18 = smov [#allocation7]  }
  0x42   : > { %v420_v6 = vsel %vm212_vm1, 1.0, %v645_v1  ;;  %s561_s28 = sshll.u32 %s646_s18, 4  ;;  %s562_s28 = int_to_ptr.vmem [resolvable:$false] %s561_s28 }
  0x43   : > { %421 = vmatmul.mubr.msk.f32.vlgmr.msra.gmra.mxu0 %vm216_vm0, %v420_v6  ;;  %p559_p8 = pnand %p558_p1, %p748_p0  ;;  %s563_s26 = scalar_lea.vmem %s562_s28, 256 }
  0x44   : > { %p564_p11 = scmp.lt.s32.totalorder %s313_s15, %s562_s28  ;;  %p565_p2 = scmp.lt.s32.totalorder %s563_s26, %s557_s27 }
  0x45   : > { %p560_p13 = pneg %p559_p8 }
  0x46   : > { %v215_v8 = vld [vmem:[%s195_s17] sm:$0x77]  ;;  %p566_p12 = por %p565_p2, %p564_p11 }
  0x48   : > { %p567_p3 = pnand %p566_p12, %p560_p13 }
 0x103   : > { %v286_v7 = vpop.f32.mrf.mxu0 }
 0x105   : > { %v288_v9 = vpop.f32.mrf.mxu0 }
 0x106   : > { %v293_v10 = vcombine.low %v286_v7, %v288_v9 }
 0x108   : > { %v295_v11 = vadd.f32 %v293_v10, %v215_v8 }
 0x10a   : > { %296 = vst [vmem:[%s195_s17] sm:$0x77] %v295_v11 }
 0x10b   : > { %570 = shalt.err (!%p567_p3)
}
 0x10c   : > { %s571_s12 = scalar_lea.hbm %s310_s23, 128  ;;  %s575_s3 = scalar_lea.hbm %s826_s2, 256 }
 0x10d   : > { %p572_p5 = scmp.ne.s32.totalorder %s310_s23, %s571_s12  ;;  %p576_p4 = scmp.lt.s32.totalorder %s310_s23, %s826_s2 }
 0x10e   : > { %p577_p10 = scmp.lt.s32.totalorder %s575_s3, %s571_s12 }
 0x10f   : > { %p573_p7 = pnand %p572_p5, %p748_p0 }
 0x110   : > { %p578_p9 = por %p577_p10, %p576_p4 }
 0x111   : > { %p574_p6 = pneg %p573_p7 }
 0x113   : > { %p579_p1 = pnand %p578_p9, %p574_p6 }
 0x115   : > { %582 = shalt.err (!%p579_p1)
}
 0x116   : > { %435 = dma.vmem_to_hbm [thread:$0]  (%p748_p0), %s313_s15, 128, %s310_s23, %s298_s24  }
 0x117 PF: > { %s324_s8 = sand.u32 1, %s621_s9   ;;  %p837_p8 = scmp.ne.s32.totalorder %s831_s20, 0 }
 0x118   : > { %p838_p13 = scmp.ge.s32.totalorder %s641_s14, 2  ;;  %s325_s21 = scalar_lea.sflag [#allocation4], %s324_s8 }
 0x11a   : > { %p446_p11 = pnand %p838_p13, %p837_p8 }
 0x11c   : > { %p447_p2 = pneg %p446_p11 }
 0x11e   : > { %616 = dma.done.wait (%p447_p2), %s325_s21, 128  }
 0x11f   : > { %618 = vsyncadd (%p447_p2), %s325_s21, 4294967168  ;;  %s19_s14 = sadd.s32 1, %s641_s14   ;;  %s839_s9 = smov %s625_s10 }
 0x120   : > { %p16_p12 = scmp.ge.s32.totalorder %s19_s14, 4   ;;  %s840_s10 = smov %s629_s11 }
 0x121   : > { %s841_s11 = smov %s754_s6  ;;  %s842_s12 = smov %s637_s13 }
 0x122   : > { %s843_s13 = smov %s845_s25  ;;  %18 = sbr.rel (!%p16_p12) target bundleno = 7 (0x7), region = 83 }
 0x127   :  { %330 = vsyncpa [#allocation3], 1 }
 0x128   :  { %332 = vsyncpa [#allocation3 + $0x1], 1 }
 0x129   :  { %333 = vsyncpa [#allocation6], 1 }
 0x12a   :  { %335 = vsyncpa [#allocation6 + $0x1], 1 }
 0x12b   :  { %336 = vsyncpa [#allocation4], 1 }
 0x12c   :  { %338 = vsyncpa [#allocation4 + $0x1], 1 }

</bundles_post_ra>
